<compile_context>
chip_gen: v7x
topology: tpu7x:2x2x1
jax: 0.10.0
libtpu: 0.0.40
codegen_flags: <defaults>
</compile_context>

<pallas_src>
import jax
import jax.numpy as jnp
from jax.experimental import pallas as pl
from jax.experimental.pallas import tpu as pltpu


def protein_cnn_kernel(x_ref, wconv_ref, bconv_ref, wlin_ref, blin_ref, out_ref):
    # x_ref    : (C_in, TB*Lp + K-1)  batch tile, rows concatenated on lanes + K-1 zero halo
    # wconv_ref: (F, K*C_in)          folded conv weight: wconv_ref[f, k*C_in + c] = W[f, c, k]
    # bconv_ref: (F, 1)               conv bias (broadcasts over lanes), f32
    # wlin_ref : (1, F)               linear weight (out_features == 1), f32
    # blin_ref : (1, 1)               linear bias, f32
    # out_ref  : (1, TB*Lp)           lane-dense output row for the whole tile
    cin = x_ref.shape[0]
    cols = out_ref.shape[1]
    k_taps = wconv_ref.shape[1] // cin

    x = x_ref[...]                                            # single VMEM load of the tile
    # K lane-shifted views stacked along the contraction (sublane) axis -> one MXU pass.
    lhs = jnp.concatenate([x[:, k:k + cols] for k in range(k_taps)], axis=0)   # (K*C_in, cols)
    h = jnp.dot(wconv_ref[...], lhs, preferred_element_type=jnp.float32)       # (F, cols), f32 acc
    h = jnp.maximum(h + bconv_ref[...], 0.0)                                   # f32 epilogue (v5e-safe)
    y = jnp.dot(wlin_ref[...], h, preferred_element_type=jnp.float32)          # (1, cols)
    out_ref[...] = (y + blin_ref[...]).astype(out_ref.dtype)                   # one wide store


def _choose_batch_tile(B, Lp):
    # Largest batch tile such that the flat lane width TB*Lp stays under ~32K
    # (f32 intermediates stay well inside scoped VMEM on every generation),
    # while keeping >= 2 grid steps when B >= 2 so v7x's two TCs both get work.
    max_cols = 32 * 1024
    tb_cap = max(1, max_cols // Lp)
    if B <= 1:
        return 1
    return max(1, min(-(-B // 2), tb_cap))


def protein_cnn_forward(x, wconv, bconv, wlin, blin, *, compute_dtype=jnp.bfloat16):
    """x: (B, L, C_in) (the layout the PyTorch module's forward receives).
    wconv: (F, C_in, K) (PyTorch Conv1d weight layout), bconv: (F,),
    wlin: (1, F), blin: (1,). Returns (B, L), matching x.squeeze(-1)."""
    B, L, cin = x.shape
    f_out, _, k_taps = wconv.shape

    # PyTorch padding='same' (stride=1, dilation=1): left = (K-1)//2, right = rest.
    pad_l = (k_taps - 1) // 2
    pad_r = (k_taps - 1) - pad_l
    lp = L + k_taps - 1

    tb = _choose_batch_tile(B, lp)
    g = -(-B // tb)
    b_pad = g * tb
    cols = tb * lp                        # output lane width per tile
    cols_in = cols + (k_taps - 1)         # input lane width per tile (with halo)

    # NCL layout + 'same' pad + batch pad (XLA fuses this into one small copy).
    x_ncl = jnp.transpose(x, (0, 2, 1)).astype(compute_dtype)            # (B, C_in, L)
    x_ncl = jnp.pad(x_ncl, ((0, b_pad - B), (0, 0), (pad_l, pad_r)))     # (B_pad, C_in, Lp)
    # Concatenate each tile's batch rows along the lane axis and append the K-1 halo.
    x_tiles = (x_ncl.reshape(g, tb, cin, lp)
                     .transpose(0, 2, 1, 3)
                     .reshape(g, cin, cols))
    x_tiles = jnp.pad(x_tiles, ((0, 0), (0, 0), (0, k_taps - 1)))        # (G, C_in, cols_in)

    # Fold the K taps into one (F, K*C_in) contraction weight.
    wconv_r = (jnp.transpose(wconv, (0, 2, 1))
                  .reshape(f_out, k_taps * cin)
                  .astype(compute_dtype))
    bconv2 = bconv.reshape(f_out, 1).astype(jnp.float32)
    wlin2 = wlin.reshape(1, f_out).astype(jnp.float32)
    blin2 = blin.reshape(1, 1).astype(jnp.float32)

    out = pl.pallas_call(
        protein_cnn_kernel,
        out_shape=jax.ShapeDtypeStruct((g, 1, cols), x.dtype),
        grid=(g,),
        in_specs=[
            pl.BlockSpec((None, cin, cols_in), lambda i: (i, 0, 0)),
            pl.BlockSpec((f_out, k_taps * cin), lambda i: (0, 0)),
            pl.BlockSpec((f_out, 1), lambda i: (0, 0)),
            pl.BlockSpec((1, f_out), lambda i: (0, 0)),
            pl.BlockSpec((1, 1), lambda i: (0, 0)),
        ],
        out_specs=pl.BlockSpec((None, 1, cols), lambda i: (i, 0, 0)),
        compiler_params=pltpu.CompilerParams(dimension_semantics=("parallel",)),
    )(x_tiles, wconv_r, bconv2, wlin2, blin2)

    # Column b_local*Lp + i of tile t holds batch (t*TB + b_local), position i,
    # for i < L; the K-1 tail columns per row are don't-care and get sliced off.
    return out.reshape(b_pad, lp)[:B, :L]


def protein_cnn_reference(x, wconv, bconv, wlin, blin):
    """Pure-JAX reference with identical semantics (for correctness check)."""
    B, L, cin = x.shape
    f_out, _, k_taps = wconv.shape
    pad_l = (k_taps - 1) // 2
    x_pad = jnp.pad(x, ((0, 0), (pad_l, (k_taps - 1) - pad_l), (0, 0)))
    conv = jnp.zeros((B, L, f_out), jnp.float32)
    for k in range(k_taps):
        conv = conv + jnp.einsum("blc,fc->blf", x_pad[:, k:k + L, :], wconv[:, :, k])
    conv = jnp.maximum(conv + bconv[None, None, :], 0.0)
    out = jnp.einsum("blf,of->blo", conv, wlin) + blin[None, None, :]
    return out[..., 0]


if __name__ == "__main__":
    # Small shapes consistent with the module: batch=2, seq=16, input_dim=8,
    # num_filters=32, filter_size=3.
    B, L, input_dim, num_filters, filter_size = 2, 16, 8, 32, 3

    key = jax.random.PRNGKey(0)
    kx, kw, kb, klw, klb = jax.random.split(key, 5)

    x = jax.random.normal(kx, (B, L, input_dim), jnp.float32)

    bound_conv = 1.0 / (input_dim * filter_size) ** 0.5
    wconv = jax.random.uniform(kw, (num_filters, input_dim, filter_size),
                               jnp.float32, -bound_conv, bound_conv)
    bconv = jax.random.uniform(kb, (num_filters,), jnp.float32,
                               -bound_conv, bound_conv)
    bound_lin = 1.0 / num_filters ** 0.5
    wlin = jax.random.uniform(klw, (1, num_filters), jnp.float32,
                              -bound_lin, bound_lin)
    blin = jax.random.uniform(klb, (1,), jnp.float32, -bound_lin, bound_lin)

    ref = protein_cnn_reference(x, wconv, bconv, wlin, blin)

    # f32 MXU-input path (tighter validation of indexing / padding / epilogue).
    out_f32 = jax.block_until_ready(
        protein_cnn_forward(x, wconv, bconv, wlin, blin, compute_dtype=jnp.float32))
    assert out_f32.shape == (B, L)
    assert jnp.allclose(out_f32, ref, atol=2e-2, rtol=2e-2), \
        float(jnp.max(jnp.abs(out_f32 - ref)))

    # Default bf16 MXU-input path (f32 accumulation + f32 epilogue): only
    # input-rounding error vs. the f32 reference.
    out_bf16 = jax.block_until_ready(protein_cnn_forward(x, wconv, bconv, wlin, blin))
    assert out_bf16.shape == (B, L)
    assert jnp.allclose(out_bf16, ref, atol=5e-2, rtol=5e-2), \
        float(jnp.max(jnp.abs(out_bf16 - ref)))

    print("KERNEL_OK")
</pallas_src>

<mosaic_0001>
module attributes {stable_mosaic.version = 11 : i64} {
  func.func @protein_cnn_kernel(%arg0: i32, %arg1: memref<1x8x20xf32, #tpu.memory_space<vmem>>, %arg2: memref<32x24xf32, #tpu.memory_space<vmem>>, %arg3: memref<32x1xf32, #tpu.memory_space<vmem>>, %arg4: memref<1x32xf32, #tpu.memory_space<vmem>>, %arg5: memref<1x1xf32, #tpu.memory_space<vmem>>, %arg6: memref<1x1x18xf32, #tpu.memory_space<vmem>>) attributes {dimension_semantics = [#tpu.dimension_semantics<parallel>], iteration_bounds = array<i64: 2>, scalar_prefetch = 0 : i64, scratch_operands = 0 : i64, tpu.core_type = #tpu.core_type<tc>, window_params = [{transform_indices = @transform_0, window_bounds = array<i64: 1, 8, 20>}, {pipeline_mode = #tpu.pipeline_mode<synchronous>, transform_indices = @transform_1, window_bounds = array<i64: 32, 24>}, {pipeline_mode = #tpu.pipeline_mode<synchronous>, transform_indices = @transform_2, window_bounds = array<i64: 32, 1>}, {pipeline_mode = #tpu.pipeline_mode<synchronous>, transform_indices = @transform_3, window_bounds = array<i64: 1, 32>}, {pipeline_mode = #tpu.pipeline_mode<synchronous>, transform_indices = @transform_4, window_bounds = array<i64: 1, 1>}, {transform_indices = @transform_5, window_bounds = array<i64: 1, 1, 18>}]} {
    %c0 = arith.constant 0 : index
    %c0_0 = arith.constant 0 : index
    %c0_1 = arith.constant 0 : index
    %0 = vector.load %arg1[%c0, %c0_0, %c0_1] : memref<1x8x20xf32, #tpu.memory_space<vmem>>, vector<1x8x20xf32>
    %1 = vector.shape_cast %0 : vector<1x8x20xf32> to vector<8x20xf32>
    %2 = vector.extract_strided_slice %1 {offsets = [0, 0], sizes = [8, 18], strides = [1, 1]} : vector<8x20xf32> to vector<8x18xf32>
    %3 = vector.extract_strided_slice %1 {offsets = [0, 1], sizes = [8, 18], strides = [1, 1]} : vector<8x20xf32> to vector<8x18xf32>
    %4 = vector.extract_strided_slice %1 {offsets = [0, 2], sizes = [8, 18], strides = [1, 1]} : vector<8x20xf32> to vector<8x18xf32>
    %5 = tpu.concatenate %2, %3, %4 in 0 : vector<8x18xf32>, vector<8x18xf32>, vector<8x18xf32> -> vector<24x18xf32>
    %c0_2 = arith.constant 0 : index
    %c0_3 = arith.constant 0 : index
    %6 = vector.load %arg2[%c0_2, %c0_3] : memref<32x24xf32, #tpu.memory_space<vmem>>, vector<32x24xf32>
    %cst = arith.constant dense<0.000000e+00> : vector<32x18xf32>
    %7 = tpu.matmul %6, %5, %cst {dimension_numbers = #tpu.dot_dimension_numbers<[1], [0], [0], [1], [0, 0, 1, 1], [], []>} : vector<32x24xf32>, vector<24x18xf32>, vector<32x18xf32> -> vector<32x18xf32>
    %c0_4 = arith.constant 0 : index
    %c0_5 = arith.constant 0 : index
    %8 = vector.load %arg3[%c0_4, %c0_5] : memref<32x1xf32, #tpu.memory_space<vmem>>, vector<32x1xf32>
    %9 = vector.broadcast %8 : vector<32x1xf32> to vector<32x18xf32>
    %10 = arith.addf %7, %9 : vector<32x18xf32>
    %cst_6 = arith.constant 0.000000e+00 : f32
    %11 = vector.broadcast %cst_6 : f32 to vector<32x18xf32>
    %12 = arith.maximumf %10, %11 : vector<32x18xf32>
    %c0_7 = arith.constant 0 : index
    %c0_8 = arith.constant 0 : index
    %13 = vector.load %arg4[%c0_7, %c0_8] : memref<1x32xf32, #tpu.memory_space<vmem>>, vector<1x32xf32>
    %cst_9 = arith.constant dense<0.000000e+00> : vector<1x18xf32>
    %14 = tpu.matmul %13, %12, %cst_9 {dimension_numbers = #tpu.dot_dimension_numbers<[1], [0], [0], [1], [0, 0, 1, 1], [], []>} : vector<1x32xf32>, vector<32x18xf32>, vector<1x18xf32> -> vector<1x18xf32>
    %c0_10 = arith.constant 0 : index
    %c0_11 = arith.constant 0 : index
    %15 = vector.load %arg5[%c0_10, %c0_11] : memref<1x1xf32, #tpu.memory_space<vmem>>, vector<1x1xf32>
    %16 = vector.broadcast %15 : vector<1x1xf32> to vector<1x18xf32>
    %17 = arith.addf %14, %16 : vector<1x18xf32>
    %c0_12 = arith.constant 0 : index
    %c0_13 = arith.constant 0 : index
    %c0_14 = arith.constant 0 : index
    %18 = vector.load %arg6[%c0_12, %c0_13, %c0_14] : memref<1x1x18xf32, #tpu.memory_space<vmem>>, vector<1x1x18xf32>
    %19 = vector.shape_cast %18 : vector<1x1x18xf32> to vector<1x18xf32>
    %20 = vector.shape_cast %17 : vector<1x18xf32> to vector<1x1x18xf32>
    tpu.vector_store %arg6[%c0_12, %c0_13, %c0_14], %20 {strides = array<i32>} : memref<1x1x18xf32, #tpu.memory_space<vmem>>, vector<1x1x18xf32>,
    return
  }
  func.func @transform_0(%arg0: i32) -> (i32, i32, i32) {
    %c0_i32 = arith.constant 0 : i32
    %c0_i32_0 = arith.constant 0 : i32
    %c0_i32_1 = arith.constant 0 : i32
    return %arg0, %c0_i32, %c0_i32_0 : i32, i32, i32
  }
  func.func @transform_1(%arg0: i32) -> (i32, i32) {
    %c0_i32 = arith.constant 0 : i32
    %c0_i32_0 = arith.constant 0 : i32
    %c0_i32_1 = arith.constant 0 : i32
    return %c0_i32, %c0_i32_0 : i32, i32
  }
  func.func @transform_2(%arg0: i32) -> (i32, i32) {
    %c0_i32 = arith.constant 0 : i32
    %c0_i32_0 = arith.constant 0 : i32
    %c0_i32_1 = arith.constant 0 : i32
    return %c0_i32, %c0_i32_0 : i32, i32
  }
  func.func @transform_3(%arg0: i32) -> (i32, i32) {
    %c0_i32 = arith.constant 0 : i32
    %c0_i32_0 = arith.constant 0 : i32
    %c0_i32_1 = arith.constant 0 : i32
    return %c0_i32, %c0_i32_0 : i32, i32
  }
  func.func @transform_4(%arg0: i32) -> (i32, i32) {
    %c0_i32 = arith.constant 0 : i32
    %c0_i32_0 = arith.constant 0 : i32
    %c0_i32_1 = arith.constant 0 : i32
    return %c0_i32, %c0_i32_0 : i32, i32
  }
  func.func @transform_5(%arg0: i32) -> (i32, i32, i32) {
    %c0_i32 = arith.constant 0 : i32
    %c0_i32_0 = arith.constant 0 : i32
    %c0_i32_1 = arith.constant 0 : i32
    return %arg0, %c0_i32, %c0_i32_0 : i32, i32, i32
  }
}

</mosaic_0001>

<bundles_post_ra>
// kernel: tpu_custom_call.1
= control target key start
LH: loop header
LB: loop body
LE: loop exit
PB: predicated region body
PF: predicated region fallthrough
CT: control target
= control target key end

     0   :  { %s854_s0 = inlined_call_operand.vmem [shape: f32[2,8,20], index: 0, kind: input, shape index: {}]   ;;  %s855_s1 = inlined_call_operand.vmem [shape: f32[32,24], index: 1, kind: input, shape index: {}]   ;;  %s856_s2 = inlined_call_operand.vmem [shape: f32[32,1], index: 2, kind: input, shape index: {}]   ;;  %s857_s3 = inlined_call_operand.vmem [shape: f32[1,32], index: 3, kind: input, shape index: {}]   ;;  %s858_s4 = inlined_call_operand.<no memory space> [shape: f32[1,1], index: 4, kind: input, shape index: {}]   ;;  %s859_s5 = inlined_call_operand.hbm [shape: f32[2,1,18], index: 5, kind: output, shape index: {}]  }
   0x1   :  { %v10_v0 = vstv %s858_s4 }
   0x2   :  { %11 = vst [vmem:[#allocation2] sm:$0x1] %v10_v0 }
   0x3   :  { %12 = vsyncpa [#allocation4], 0 }
   0x4   :  { %14 = vsyncpa [#allocation4 + $0x1], 0  ;;  %s723_s20 = smov 0   ;;  %s725_s21 = smov 0  }
   0x5   :  { %s727_s22 = smov 0   ;;  %s729_s23 = smov 0  }
   0x6 LB: > { %s744_s4 = sadd.s32 4294967295, %s681_s23   ;;  %s514_s24 = sadd.s32 4294967294, %s681_s23   ;;  %s681_s23 = sphi %s729_s23, %s865_s23   ;;  %s677_s22 = sphi %s727_s22, %s864_s22   ;;  %s673_s21 = sphi %s725_s21, %s863_s21   ;;  %s669_s20 = sphi %s723_s20, %s862_s20  }
   0x7   : > { %s748_s25 = sadd.s32 1, %s681_s23   ;;  %s137_s26 = sadd.s32 1, %s677_s22 }
   0x8   : > { %s134_s27 = ssub.s32 %s681_s23, %s748_s25  ;;  %p147_p0 = scmp.ne.s32.totalorder %s677_s22, %s673_s21 }
   0x9   : > { %p135_p1 = scmp.eq.s32.totalorder %s134_s27, 0  ;;  %p148_p2 = scmp.eq.s32.totalorder %s744_s4, 1 }
   0xa   : > { %p153_p3 = scmp.ne.s32.totalorder %s673_s21, %s669_s20  ;;  %p154_p4 = scmp.eq.s32.totalorder %s514_s24, 1 }
   0xb   : > { %s759_s28 = scalar_select %p135_p1, %s677_s22, %s137_s26  }
   0xc   : > { %p761_p5 = por %p148_p2, %p147_p0  ;;  %p765_p6 = por %p154_p4, %p153_p3 }
   0xd   : > { %p517_p7 = scmp.ge.s32.totalorder %s681_s23, 1  ;;  %p191_p8 = scmp.lt.s32.totalorder %s681_s23, 3 }
   0xf   : > { %p192_p9 = pnand %p517_p7, %p191_p8 }
  0x10   : > { %p217_p10 = scmp.lt.s32.totalorder (!%p192_p9), %s744_s4, 1  ;;  %v229_v1 = vld [vmem:[%s855_s1] sm:$0xff] (!%p192_p9)  ;;  %vm257_vm0 = vcmask (!%p192_p9), 195584   ;;  %s683_s15 = smov (!%p192_p9), 127   ;;  %v684_v4 = vmov (!%p192_p9), 0   ;;  %v234_v5 = vld [vmem:[%s856_s2 + $0x8] sm:$0xff] (!%p192_p9)  ;;  %v366_v36 = vlaneseq (!%p192_p9) }
  0x11   : > { %195 = sbr.rel (%p192_p9) target bundleno = 606 (0x25e), region = 40  ;;  %545 = vmatprep.mubr.msk.f32.mxu0 (!%p192_p9), %vm257_vm0, %v229_v1  ;;  %v233_v3 = vld [vmem:[%s856_s2] sm:$0xff] (!%p192_p9)  ;;  %617 = vset.pattern.permute.xlu1 (!%p192_p9), %v684_v4  ;;  %s685_s18 = smov (!%p192_p9), 126   ;;  %v235_v6 = vld [vmem:[%s856_s2 + $0x10] sm:$0xff] (!%p192_p9)  ;;  %v236_v7 = vld [vmem:[%s856_s2 + $0x18] sm:$0xff] (!%p192_p9)  ;;  %v686_v15 = vmov (!%p192_p9), 0.0|0.0  }
  0x12   : > { %239 = vperm.xlu1 (!%p192_p9), %617, %v233_v3   ;;  %618 = vset.pattern.permute.xlu0 (!%p192_p9), %v684_v4  ;;  %v360_v8 = vld [vmem:[#allocation2] sm:$0x1] (!%p192_p9)  ;;  %v230_v12 = vld [vmem:[%s855_s1 + $0x8] sm:$0xff] (!%p192_p9)  ;;  %v231_v13 = vld [vmem:[%s855_s1 + $0x10] sm:$0xff] (!%p192_p9)  ;;  %vm687_vm1 = vmmov (!%p192_p9), 0   ;;  %v688_v16 = vmov (!%p192_p9), 0.0  }
  0x13   : > { %v232_v14 = vld [vmem:[%s855_s1 + $0x18] sm:$0xff] (!%p192_p9)  ;;  %566 = vmatprep.subr.bf16.mxu1 (!%p192_p9), %v686_v15  ;;  %559 = vmatprep.mubr.msk.f32.mxu1 (!%p192_p9), %vm687_vm1, %v688_v16  ;;  %v359_v35 = vld [vmem:[%s857_s3] sm:$0x1] (!%p192_p9)  ;;  %vm370_vm2 = vcmask (!%p192_p9), 261120   ;;  %v367_v37 = vshrl.u32 (!%p192_p9), %v366_v36, 7  ;;  %s215_s14 = sand.u32 (!%p192_p9), 1, %s673_s21  }
  0x14   : > { %s216_s16 = scalar_lea.vmem (!%p192_p9), [#allocation3], %s215_s14  ;;  %vm444_vm3 = vcmask (!%p192_p9), 139264   ;;  %s447_s26 = scalar_lea.sflag (!%p192_p9), [#allocation4], %s215_s14 }
  0x15   : > { %v368_v38 = vsub.s32 (!%p192_p9), 0, %v367_v37  ;;  %s459_s17 = sshll.u32 (!%p192_p9), %s216_s16, 4  ;;  %s689_s27 = smov (!%p192_p9), [#allocation3]   ;;  %s814_s17 = int_to_ptr.vmem [resolvable:$true] %s459_s17 }
  0x16   : > { %244 = vperm.xlu1 (!%p192_p9), %617, %v234_v5   ;;  %s623_s6 = sshll.u32 (!%p192_p9), %s689_s27, 4  ;;  %s624_s6 = int_to_ptr.vmem [resolvable:$false] %s623_s6 }
  0x17   : > { %s625_s7 = scalar_lea.vmem (!%p192_p9), %s624_s6, 32  ;;  %p626_p0 = scmp.lt.s32.totalorder (!%p192_p9), %s814_s17, %s624_s6 }
  0x18   : > { %s218_s8 = scalar_select %p217_p10, %s744_s4, 1 }
  0x1a   : > { %s518_s9 = sshll.u32 %s218_s8, 3  ;;  %254 = vperm.xlu1 %617, %v236_v7  }
  0x1b   : > { %s220_s12 = scalar_lea.vmem %s854_s0, %s518_s9 }
  0x1c   : > { %v221_v2 = vld [vmem:[%s220_s12] sm:$0xff] }
  0x1d   : > { %223 = vrot.lane.b32.xlu0 %v221_v2, %s683_s15  ;;  %s524_s15 = sshll.u32 %s744_s4, 4  ;;  %s619_s4 = scalar_lea.vmem %s814_s17, 16 }
  0x1e   : > { %363 = vperm.xlu1 %617, %v360_v8   ;;  %s812_s24 = scalar_lea.hbm %s859_s5, %s524_s15  ;;  %p620_p11 = scmp.ne.s32.totalorder %s814_s17, %s619_s4 }
  0x1f   : > { %p627_p1 = scmp.lt.s32.totalorder %s625_s7, %s619_s4 }
  0x20   : > { %p621_p12 = pnand %p620_p11, %p761_p5 }
  0x21   : > { %226 = vrot.lane.b32.xlu0 %v221_v2, %s685_s18  ;;  %p628_p2 = por %p627_p1, %p626_p0 }
  0x22   : > { %p622_p13 = pneg %p621_p12 }
  0x24   : > { %p629_p3 = pnand %p628_p2, %p622_p13 }
  0x25   : > { %249 = vperm.xlu0 %618, %v235_v6  }
  0x8f   : > { %v224_v9 = vpop.permute.xlu0 %223 }
  0x90   : > { %v562_v10 = vpack.c.bf16 %v224_v9, %v221_v2 }
  0x91   : > { %v240_v17 = vpop.permute.xlu1 %239 }
  0x92   : > { %563 = vmatprep.subr.bf16.mxu0 %v562_v10 }
  0x93   : > { %565 = vmatpush3.bf16.msra.mxu0 %v562_v10  ;;  %v227_v11 = vpop.permute.xlu0 %226 }
  0x94   : > { %543 = vmatprep.subr.mxu0 %v227_v11 }
  0x95   : > { %v245_v18 = vpop.permute.xlu1 %244 }
  0x97   : > { %544 = vmatpush3.msra.mxu0 %v227_v11 }
  0x98   : > { %546 = vmatmul.mubr.msk.f32.vlgmr.msra.gmra.mrb[0].mxu0 %vm257_vm0, %v230_v12 }
  0x99   : > { %548 = vmatprep.mubr.msk.f32.mxu0 %vm257_vm0, %v231_v13  ;;  %v255_v25 = vpop.permute.xlu1 %254 }
  0x9c   : > { %549 = vmatmul.mubr.msk.f32.gmra.mrb[2].mxu0 %vm257_vm0, %v232_v14 }
  0x9d   : > { %v364_v39 = vpop.permute.xlu1 %363 }
  0x9e   : > { %v369_v40 = vrot.slane %v364_v39, %v368_v38 }
  0xa4   : > { %v250_v24 = vpop.permute.xlu0 %249 }
 0x16b   : > { %v547_v19 = vpop.f32.mrb[0].mxu0 }
 0x16c   : > { %v342_v20 = vadd.f32 %v547_v19, %v245_v18  ;;  %v336_v21 = vpop.f32.mrb[1].mxu0 }
 0x16d   : > { %v337_v22 = vadd.f32 %v336_v21, %v240_v17 }
 0x16e   : > { %v356_v23 = vmax.f32 %v342_v20, 0.0 }
 0x16f   : > { %v355_v26 = vmax.f32 %v337_v22, 0.0  ;;  %v550_v27 = vpop.f32.mrb[2].mxu0 }
 0x170   : > { %v352_v28 = vadd.f32 %v550_v27, %v255_v25  ;;  %v346_v29 = vpop.f32.mrb[3].mxu0 }
 0x171   : > { %v347_v30 = vadd.f32 %v346_v29, %v250_v24  ;;  %v567_v31 = vpack.c.bf16 %v356_v23, %v355_v26 }
 0x172   : > { %v358_v32 = vmax.f32 %v352_v28, 0.0 }
 0x173   : > { %v357_v33 = vmax.f32 %v347_v30, 0.0  ;;  %568 = vmatpush3.bf16.msra.mxu1 %v567_v31 }
 0x174   : > { %569 = vmatprep.subr.bf16.mxu1 %v686_v15 }
 0x175   : > { %v570_v34 = vpack.c.bf16 %v358_v32, %v357_v33 }
 0x177   : > { %571 = vmatpush3.bf16.msra.mxu1 %v570_v34 }
 0x17a   : > { %560 = vmatmul.mubr.msk.f32.vlgmr.msra.gmra.mrb[0].mxu1 %vm370_vm2, %v359_v35 }
 0x24d   : > { %v440_v41 = vpop.f32.mrb[0].mxu1 }
 0x24e   : > { %v441_v42 = vadd.f32 %v440_v41, %v369_v40  ;;  %v561_v43 = vpop.f32.mrb[1].mxu1 }
 0x250   : > { %445 = vst.msk [vmem:[%s216_s16] sm:$0x1] %vm444_vm3, %v441_v42 }
 0x251   : > { %632 = shalt.err (!%p629_p3)
}
 0x252   : > { %s633_s8 = scalar_lea.hbm %s812_s24, 16  ;;  %s637_s11 = scalar_lea.hbm %s859_s5, 32 }
 0x253   : > { %p634_p4 = scmp.ne.s32.totalorder %s812_s24, %s633_s8  ;;  %p638_p9 = scmp.lt.u32.totalorder %s812_s24, %s859_s5 }
 0x254   : > { %p639_p10 = scmp.lt.u32.totalorder %s637_s11, %s633_s8  ;;  %p641_p12 = scmp.lt.u32.totalorder %s633_s8, %s812_s24 }
 0x255   : > { %p635_p7 = pnand %p634_p4, %p761_p5 }
 0x256   : > { %p640_p11 = por %p639_p10, %p638_p9 }
 0x257   : > { %p636_p8 = pneg %p635_p7 }
 0x258   : > { %p642_p13 = por %p641_p12, %p640_p11 }
 0x25a   : > { %p643_p0 = pnand %p642_p13, %p636_p8 }
 0x25c   : > { %646 = shalt.err (!%p643_p0)
}
 0x25d   : > { %572 = dma.vmem_to_hbm [thread:$0]  (%p761_p5), %s814_s17, 16, %s812_s24, %s447_s26  }
 0x25e PF: > { %p578_p1 = scmp.ge.s32.totalorder %s681_s23, 2  ;;  %s471_s14 = sand.u32 1, %s669_s20  }
 0x25f   : > { %s472_s15 = scalar_lea.sflag [#allocation4], %s471_s14 }
 0x260   : > { %p575_p2 = pnand %p578_p1, %p765_p6 }
 0x262   : > { %664 = dma.done.wait (!%p575_p2), %s472_s15, 16  }
 0x263   : > { %666 = vsyncadd (!%p575_p2), %s472_s15, 4294967280  ;;  %p17_p3 = scmp.ge.s32.totalorder %s748_s25, 4   ;;  %s862_s20 = smov %s673_s21 }
 0x264   : > { %s863_s21 = smov %s677_s22  ;;  %s864_s22 = smov %s759_s28 }
 0x265   : > { %s865_s23 = smov %s748_s25  ;;  %19 = sbr.rel (!%p17_p3) target bundleno = 6 (0x6), region = 75 }
 0x26c   :  { %476 = vsyncpa [#allocation4], 1 }
 0x26d   :  { %478 = vsyncpa [#allocation4 + $0x1], 1 }

</bundles_post_ra>
